<compile_context>
chip_gen: v7x
topology: tpu7x:2x2x1
jax: 0.10.0
libtpu: 0.0.40
codegen_flags: <defaults>
</compile_context>

<pallas_src>
import jax
import jax.numpy as jnp
import numpy as np
from jax.experimental import pallas as pl
from jax.experimental.pallas import tpu as pltpu

HP_PAD = 128  # hidden dim (20) zero-padded to one full lane width


def mlp_kernel(x_ref, w1_ref, b1_ref, w2_ref, b2_ref, w3_ref, b3_ref, o_ref):
    def sigmoid(v):
        # Single EUP tanh instead of exp + reciprocal; numerically equivalent.
        return 0.5 * (jnp.tanh(0.5 * v) + 1.0)

    # Layer 1: Linear + Sigmoid (lane-dense 128-wide hidden, f32 accumulation).
    h1 = jnp.dot(x_ref[...], w1_ref[...], preferred_element_type=jnp.float32)
    h1 = sigmoid(h1 + b1_ref[...])

    # Layer 2: Linear + Sigmoid.  Feed the MXU in the weights' storage dtype
    # (no-op for f32, a VPU cast for bf16); accumulate in f32.
    h1 = h1.astype(w2_ref.dtype)
    h2 = jnp.dot(h1, w2_ref[...], preferred_element_type=jnp.float32)
    h2 = sigmoid(h2 + b2_ref[...])

    # Layer 3: w3 is a single output column -> VPU multiply + XLU lane-reduce
    # against a (1, HP) row instead of a mostly-zero 128x128 MXU pass.
    # Zero lanes of w3 cancel the sigmoid(0)=0.5 values in padded h2 lanes.
    out = jnp.sum(h2 * w3_ref[...], axis=-1, keepdims=True) + b3_ref[0, 0]
    o_ref[...] = out.astype(o_ref.dtype)  # narrow (bb, 1) store


def net_forward(x, padded_params, *, block_b=4096, compute_dtype=None):
    """x: (B, F) f32.  padded_params from pad_params().  Returns (B, 1) f32.

    compute_dtype: optional storage dtype (e.g. jnp.bfloat16 on v6e/v7x) for
    x / w1 / w2; accumulation, biases and activations stay f32.
    """
    w1, b1, w2, b2, w3, b3 = padded_params
    B, F = x.shape
    HP = w1.shape[1]

    # --- batch blocking: never collapse into one oversized block -------------
    block_b = max(8, (block_b // 8) * 8)          # sublane multiple
    B8 = int(np.ceil(max(B, 1) / 8)) * 8          # sublane-pad the batch
    if B8 <= block_b:
        bb = B8                                   # single step, no extra padding
        B_pad = B8
    else:
        bb = block_b                              # pad batch UP to a block multiple
        B_pad = int(np.ceil(B8 / bb)) * bb
    if B_pad != B:
        x = jnp.pad(x, ((0, B_pad - B), (0, 0)))

    # Optional bf16 storage (v6e/v7x): halves the dominant x read stream.
    if compute_dtype is not None:
        x = x.astype(compute_dtype)
        w1 = w1.astype(compute_dtype)
        w2 = w2.astype(compute_dtype)

    grid = (B_pad // bb,)

    xbytes = jnp.dtype(x.dtype).itemsize
    wbytes = jnp.dtype(w1.dtype).itemsize
    flops = 2 * B_pad * (F * HP + HP * HP + HP)
    bytes_accessed = (B_pad * F * xbytes                 # x read
                      + (F * HP + HP * HP) * wbytes      # w1, w2
                      + (3 * HP + 1) * 4                 # b1, b2, w3 row, b3
                      + B_pad * 4)                       # narrow (B_pad, 1) output
    cost = pl.CostEstimate(
        flops=flops,
        transcendentals=2 * B_pad * HP,
        bytes_accessed=bytes_accessed,
    )

    out = pl.pallas_call(
        mlp_kernel,
        out_shape=jax.ShapeDtypeStruct((B_pad, 1), jnp.float32),
        grid=grid,
        in_specs=[
            pl.BlockSpec((bb, F), lambda i: (i, 0)),            # x: tiled over batch
            pl.BlockSpec((F, HP), lambda i: (0, 0)),            # w1: resident
            pl.BlockSpec((1, HP), lambda i: (0, 0)),            # b1
            pl.BlockSpec((HP, HP), lambda i: (0, 0)),           # w2: resident
            pl.BlockSpec((1, HP), lambda i: (0, 0)),            # b2
            pl.BlockSpec((1, HP), lambda i: (0, 0)),            # w3 row
            pl.BlockSpec(memory_space=pltpu.MemorySpace.SMEM),  # b3 scalar
        ],
        out_specs=pl.BlockSpec((bb, 1), lambda i: (i, 0)),
        compiler_params=pltpu.CompilerParams(
            dimension_semantics=("parallel",),
        ),
        cost_estimate=cost,
    )(x, w1, b1, w2, b2, w3, b3)

    # Strip batch padding only if any was added (no-op extra kernels at B=8).
    if B_pad != B:
        out = out[:B]
    return out


def init_params(key, in_features, hidden_size):
    """Unpadded params, PyTorch-Linear-style init, stored pre-transposed (in, out)."""
    k1, k2, k3, k4, k5, k6 = jax.random.split(key, 6)
    s1 = 1.0 / np.sqrt(in_features)
    s2 = 1.0 / np.sqrt(hidden_size)
    w1 = jax.random.uniform(k1, (in_features, hidden_size), jnp.float32, -s1, s1)
    b1 = jax.random.uniform(k2, (1, hidden_size), jnp.float32, -s1, s1)
    w2 = jax.random.uniform(k3, (hidden_size, hidden_size), jnp.float32, -s2, s2)
    b2 = jax.random.uniform(k4, (1, hidden_size), jnp.float32, -s2, s2)
    w3 = jax.random.uniform(k5, (hidden_size, 1), jnp.float32, -s2, s2)
    b3 = jax.random.uniform(k6, (1, 1), jnp.float32, -s2, s2)
    return (w1, b1, w2, b2, w3, b3)


def pad_params(params, hp=HP_PAD):
    """Zero-pad params to lane-dense shapes.  Zero rows of w2 and zero lanes of
    the w3 row guarantee sigmoid(0)=0.5 padding values never leak into the
    output.  NOTE: if these padded params are ever trained in padded form, the
    pad entries must be re-zeroed after each update (or keep masters unpadded)."""
    w1, b1, w2, b2, w3, b3 = params
    F, H = w1.shape
    w1p = jnp.pad(w1, ((0, 0), (0, hp - H)))
    b1p = jnp.pad(b1, ((0, 0), (0, hp - H)))
    w2p = jnp.pad(w2, ((0, hp - H), (0, hp - H)))
    b2p = jnp.pad(b2, ((0, 0), (0, hp - H)))
    w3p = jnp.pad(w3.reshape(1, H), ((0, 0), (0, hp - H)))  # (1, HP) row, no 128x pad
    return (w1p, b1p, w2p, b2p, w3p, b3)


def net_forward_ref(x, params):
    w1, b1, w2, b2, w3, b3 = params
    h1 = jax.nn.sigmoid(x @ w1 + b1)
    h2 = jax.nn.sigmoid(h1 @ w2 + b2)
    return h2 @ w3 + b3


if __name__ == "__main__":
    # Small synthetic shapes consistent with the module:
    # data_train.shape[1] (in_features) = 32, hidden_size = 20, batch = 8.
    B, F, H = 8, 32, 20

    key = jax.random.PRNGKey(0)
    kx, kp = jax.random.split(key)
    x = jax.random.normal(kx, (B, F), dtype=jnp.float32)
    params = init_params(kp, F, H)
    padded = pad_params(params)

    ref = net_forward_ref(x, params)

    # f32 storage path (exact, all generations).
    out = jax.block_until_ready(net_forward(x, padded))
    assert out.shape == (B, 1)
    np.testing.assert_allclose(np.asarray(out), np.asarray(ref), rtol=1e-5, atol=1e-5)

    # bf16 storage path (v6e/v7x input-bandwidth optimization); f32 accumulation.
    out_bf16 = jax.block_until_ready(net_forward(x, padded, compute_dtype=jnp.bfloat16))
    assert out_bf16.shape == (B, 1)
    np.testing.assert_allclose(np.asarray(out_bf16), np.asarray(ref), rtol=0, atol=5e-2)

    print("KERNEL_OK")
</pallas_src>

<mosaic_0001>
module attributes {stable_mosaic.version = 11 : i64} {
  func.func @mlp_kernel(%arg0: i32, %arg1: memref<8x32xf32, #tpu.memory_space<vmem>>, %arg2: memref<32x128xf32, #tpu.memory_space<vmem>>, %arg3: memref<1x128xf32, #tpu.memory_space<vmem>>, %arg4: memref<128x128xf32, #tpu.memory_space<vmem>>, %arg5: memref<1x128xf32, #tpu.memory_space<vmem>>, %arg6: memref<1x128xf32, #tpu.memory_space<vmem>>, %arg7: memref<1x1xf32, #tpu.memory_space<smem>>, %arg8: memref<8x1xf32, #tpu.memory_space<vmem>>) attributes {dimension_semantics = [#tpu.dimension_semantics<parallel>], iteration_bounds = array<i64: 1>, scalar_prefetch = 0 : i64, scratch_operands = 0 : i64, tpu.core_type = #tpu.core_type<tc>, window_params = [{transform_indices = @transform_0, window_bounds = array<i64: 8, 32>}, {pipeline_mode = #tpu.pipeline_mode<synchronous>, transform_indices = @transform_1, window_bounds = array<i64: 32, 128>}, {pipeline_mode = #tpu.pipeline_mode<synchronous>, transform_indices = @transform_2, window_bounds = array<i64: 1, 128>}, {pipeline_mode = #tpu.pipeline_mode<synchronous>, transform_indices = @transform_3, window_bounds = array<i64: 128, 128>}, {pipeline_mode = #tpu.pipeline_mode<synchronous>, transform_indices = @transform_4, window_bounds = array<i64: 1, 128>}, {pipeline_mode = #tpu.pipeline_mode<synchronous>, transform_indices = @transform_5, window_bounds = array<i64: 1, 128>}, {transform_indices = @transform_6, window_bounds = array<i64: 1, 1>}, {transform_indices = @transform_7, window_bounds = array<i64: 8, 1>}]} {
    %c0 = arith.constant 0 : index
    %c0_0 = arith.constant 0 : index
    %0 = vector.load %arg1[%c0, %c0_0] : memref<8x32xf32, #tpu.memory_space<vmem>>, vector<8x32xf32>
    %c0_1 = arith.constant 0 : index
    %c0_2 = arith.constant 0 : index
    %1 = vector.load %arg2[%c0_1, %c0_2] : memref<32x128xf32, #tpu.memory_space<vmem>>, vector<32x128xf32>
    %cst = arith.constant dense<0.000000e+00> : vector<8x128xf32>
    %2 = tpu.matmul %0, %1, %cst {dimension_numbers = #tpu.dot_dimension_numbers<[1], [0], [0], [1], [0, 0, 1, 1], [], []>} : vector<8x32xf32>, vector<32x128xf32>, vector<8x128xf32> -> vector<8x128xf32>
    %c0_3 = arith.constant 0 : index
    %c0_4 = arith.constant 0 : index
    %3 = vector.load %arg3[%c0_3, %c0_4] : memref<1x128xf32, #tpu.memory_space<vmem>>, vector<1x128xf32>
    %4 = vector.broadcast %3 : vector<1x128xf32> to vector<8x128xf32>
    %5 = arith.addf %2, %4 : vector<8x128xf32>
    %cst_5 = arith.constant 5.000000e-01 : f32
    %6 = vector.broadcast %cst_5 : f32 to vector<8x128xf32>
    %7 = arith.mulf %6, %5 : vector<8x128xf32>
    %8 = math.tanh %7 : vector<8x128xf32>
    %cst_6 = arith.constant 1.000000e+00 : f32
    %9 = vector.broadcast %cst_6 : f32 to vector<8x128xf32>
    %10 = arith.addf %8, %9 : vector<8x128xf32>
    %cst_7 = arith.constant 5.000000e-01 : f32
    %11 = vector.broadcast %cst_7 : f32 to vector<8x128xf32>
    %12 = arith.mulf %11, %10 : vector<8x128xf32>
    %c0_8 = arith.constant 0 : index
    %c0_9 = arith.constant 0 : index
    %13 = vector.load %arg4[%c0_8, %c0_9] : memref<128x128xf32, #tpu.memory_space<vmem>>, vector<128x128xf32>
    %cst_10 = arith.constant dense<0.000000e+00> : vector<8x128xf32>
    %14 = tpu.matmul %12, %13, %cst_10 {dimension_numbers = #tpu.dot_dimension_numbers<[1], [0], [0], [1], [0, 0, 1, 1], [], []>} : vector<8x128xf32>, vector<128x128xf32>, vector<8x128xf32> -> vector<8x128xf32>
    %c0_11 = arith.constant 0 : index
    %c0_12 = arith.constant 0 : index
    %15 = vector.load %arg5[%c0_11, %c0_12] : memref<1x128xf32, #tpu.memory_space<vmem>>, vector<1x128xf32>
    %16 = vector.broadcast %15 : vector<1x128xf32> to vector<8x128xf32>
    %17 = arith.addf %14, %16 : vector<8x128xf32>
    %cst_13 = arith.constant 5.000000e-01 : f32
    %18 = vector.broadcast %cst_13 : f32 to vector<8x128xf32>
    %19 = arith.mulf %18, %17 : vector<8x128xf32>
    %20 = math.tanh %19 : vector<8x128xf32>
    %cst_14 = arith.constant 1.000000e+00 : f32
    %21 = vector.broadcast %cst_14 : f32 to vector<8x128xf32>
    %22 = arith.addf %20, %21 : vector<8x128xf32>
    %cst_15 = arith.constant 5.000000e-01 : f32
    %23 = vector.broadcast %cst_15 : f32 to vector<8x128xf32>
    %24 = arith.mulf %23, %22 : vector<8x128xf32>
    %c0_16 = arith.constant 0 : index
    %c0_17 = arith.constant 0 : index
    %25 = vector.load %arg6[%c0_16, %c0_17] : memref<1x128xf32, #tpu.memory_space<vmem>>, vector<1x128xf32>
    %26 = vector.broadcast %25 : vector<1x128xf32> to vector<8x128xf32>
    %27 = arith.mulf %24, %26 : vector<8x128xf32>
    %cst_18 = arith.constant dense<0.000000e+00> : vector<8xf32>
    %28 = vector.multi_reduction <add>, %27, %cst_18 [1] : vector<8x128xf32> to vector<8xf32>
    %29 = vector.shape_cast %28 : vector<8xf32> to vector<8x1xf32>
    %c0_19 = arith.constant 0 : index
    %c0_20 = arith.constant 0 : index
    %30 = memref.load %arg7[%c0_19, %c0_20] : memref<1x1xf32, #tpu.memory_space<smem>>
    %31 = vector.broadcast %30 : f32 to vector<8x1xf32>
    %32 = arith.addf %29, %31 : vector<8x1xf32>
    %c0_21 = arith.constant 0 : index
    %c0_22 = arith.constant 0 : index
    %33 = vector.load %arg8[%c0_21, %c0_22] : memref<8x1xf32, #tpu.memory_space<vmem>>, vector<8x1xf32>
    tpu.vector_store %arg8[%c0_21, %c0_22], %32 {strides = array<i32>} : memref<8x1xf32, #tpu.memory_space<vmem>>, vector<8x1xf32>,
    return
  }
  func.func @transform_0(%arg0: i32) -> (i32, i32) {
    %c0_i32 = arith.constant 0 : i32
    %c0_i32_0 = arith.constant 0 : i32
    return %arg0, %c0_i32 : i32, i32
  }
  func.func @transform_1(%arg0: i32) -> (i32, i32) {
    %c0_i32 = arith.constant 0 : i32
    %c0_i32_0 = arith.constant 0 : i32
    %c0_i32_1 = arith.constant 0 : i32
    return %c0_i32, %c0_i32_0 : i32, i32
  }
  func.func @transform_2(%arg0: i32) -> (i32, i32) {
    %c0_i32 = arith.constant 0 : i32
    %c0_i32_0 = arith.constant 0 : i32
    %c0_i32_1 = arith.constant 0 : i32
    return %c0_i32, %c0_i32_0 : i32, i32
  }
  func.func @transform_3(%arg0: i32) -> (i32, i32) {
    %c0_i32 = arith.constant 0 : i32
    %c0_i32_0 = arith.constant 0 : i32
    %c0_i32_1 = arith.constant 0 : i32
    return %c0_i32, %c0_i32_0 : i32, i32
  }
  func.func @transform_4(%arg0: i32) -> (i32, i32) {
    %c0_i32 = arith.constant 0 : i32
    %c0_i32_0 = arith.constant 0 : i32
    %c0_i32_1 = arith.constant 0 : i32
    return %c0_i32, %c0_i32_0 : i32, i32
  }
  func.func @transform_5(%arg0: i32) -> (i32, i32) {
    %c0_i32 = arith.constant 0 : i32
    %c0_i32_0 = arith.constant 0 : i32
    %c0_i32_1 = arith.constant 0 : i32
    return %c0_i32, %c0_i32_0 : i32, i32
  }
  func.func @transform_6(%arg0: i32) -> (i32, i32) {
    %c0_i32 = arith.constant 0 : i32
    %c0_i32_0 = arith.constant 0 : i32
    %c0_i32_1 = arith.constant 0 : i32
    return %c0_i32, %c0_i32_0 : i32, i32
  }
  func.func @transform_7(%arg0: i32) -> (i32, i32) {
    %c0_i32 = arith.constant 0 : i32
    %c0_i32_0 = arith.constant 0 : i32
    return %arg0, %c0_i32 : i32, i32
  }
}

</mosaic_0001>

<bundles_post_ra>
// kernel: tpu_custom_call.1
= control target key start
LH: loop header
LB: loop body
LE: loop exit
PB: predicated region body
PF: predicated region fallthrough
CT: control target
= control target key end

     0   :  { %13 = vsyncpa [#allocation4], 0  ;;  %s563_s0 = inlined_call_operand.hbm [shape: f32[8,32], index: 0, kind: input, shape index: {}]   ;;  %s564_s1 = inlined_call_operand.hbm [shape: f32[32,128], index: 1, kind: input, shape index: {}]   ;;  %s565_s2 = inlined_call_operand.vmem [shape: f32[1,128], index: 2, kind: input, shape index: {}]   ;;  %s566_s3 = inlined_call_operand.hbm [shape: f32[128,128], index: 3, kind: input, shape index: {}]   ;;  %s567_s4 = inlined_call_operand.vmem [shape: f32[1,128], index: 4, kind: input, shape index: {}]   ;;  %s568_s5 = inlined_call_operand.vmem [shape: f32[1,128], index: 5, kind: input, shape index: {}]   ;;  %s569_s6 = inlined_call_operand.<no memory space> [shape: f32[1,1], index: 6, kind: input, shape index: {}]   ;;  %s570_s7 = inlined_call_operand.vmem [shape: f32[8,1], index: 7, kind: output, shape index: {}]  }
   0x1   :  { %14 = vsyncpa [#allocation6], 0  ;;  %s458_s24 = smov [#allocation5]   ;;  %s388_s28 = scalar_lea.hbm %s564_s1, 512 }
   0x2   :  { %s30_s25 = sshll.u32 %s458_s24, 4  ;;  %p389_p0 = scmp.ne.s32.totalorder %s564_s1, %s388_s28  ;;  %s31_s25 = int_to_ptr.vmem [resolvable:$true] %s30_s25 }
   0x3   :  { %p392_p1 = scmp.lt.u32.totalorder %s388_s28, %s564_s1 }
   0x5   :  { %p394_p2 = pnand %p392_p1, %p389_p0 }
   0x7   :  { %397 = shalt.err (!%p394_p2)
}
   0x8   :  { %s398_s10 = scalar_lea.vmem %s31_s25, 512  ;;  %p403_p4 = scmp.lt.s32.totalorder %s31_s25, %s31_s25 }
   0x9   :  { %p399_p3 = scmp.ne.s32.totalorder %s31_s25, %s398_s10  ;;  %p404_p5 = scmp.lt.s32.totalorder %s398_s10, %s398_s10 }
   0xb   :  { %p405_p6 = por %p404_p5, %p403_p4 }
   0xd   :  { %p406_p7 = pnand %p405_p6, %p399_p3 }
   0xf   :  { %409 = shalt.err (!%p406_p7)
}
  0x10   :  { %s459_s11 = smov 128   ;;  %s460_s12 = smov 8  }
  0x11   :  { %36 = dma.hbm_to_vmem [thread:$0]  %s564_s1, 512, %s31_s25, [#allocation6], %s459_s11, %s459_s11, %s460_s12  }
  0x12   :  { %s461_s15 = smov [#allocation3]   ;;  %s462_s17 = smov [#allocation7]  }
  0x13   :  { %s21_s16 = sshll.u32 %s461_s15, 4  ;;  %s44_s18 = sshll.u32 %s462_s17, 4  ;;  %s22_s16 = int_to_ptr.vmem [resolvable:$true] %s21_s16  ;;  %s45_s18 = int_to_ptr.vmem [resolvable:$true] %s44_s18 }
  0x14   :  { %s410_s21 = scalar_lea.hbm %s563_s0, 128 }
  0x15   :  { %p411_p8 = scmp.ne.s32.totalorder %s563_s0, %s410_s21  ;;  %p414_p9 = scmp.lt.u32.totalorder %s410_s21, %s563_s0 }
  0x17   :  { %p416_p10 = pnand %p414_p9, %p411_p8 }
  0x19   :  { %419 = shalt.err (!%p416_p10)
}
  0x1a   :  { %s420_s1 = scalar_lea.vmem %s22_s16, 128  ;;  %p425_p12 = scmp.lt.s32.totalorder %s22_s16, %s22_s16 }
  0x1b   :  { %p421_p11 = scmp.ne.s32.totalorder %s22_s16, %s420_s1  ;;  %p426_p13 = scmp.lt.s32.totalorder %s420_s1, %s420_s1 }
  0x1d   :  { %p427_p0 = por %p426_p13, %p425_p12 }
  0x1f   :  { %p428_p1 = pnand %p427_p0, %p421_p11 }
  0x21   :  { %431 = shalt.err (!%p428_p1)
}
  0x22   :  { %24 = dma.hbm_to_vmem [thread:$0]  %s563_s0, 128, %s22_s16, [#allocation4]  }
  0x23   :  { %s432_s30 = scalar_lea.hbm %s566_s3, 2048 }
  0x24   :  { %p433_p2 = scmp.ne.s32.totalorder %s566_s3, %s432_s30  ;;  %p436_p3 = scmp.lt.u32.totalorder %s432_s30, %s566_s3 }
  0x26   :  { %p438_p4 = pnand %p436_p3, %p433_p2 }
  0x28   :  { %441 = shalt.err (!%p438_p4)
}
  0x29   :  { %s442_s14 = scalar_lea.vmem %s45_s18, 2048  ;;  %p447_p6 = scmp.lt.s32.totalorder %s45_s18, %s45_s18 }
  0x2a   :  { %p443_p5 = scmp.ne.s32.totalorder %s45_s18, %s442_s14  ;;  %p448_p7 = scmp.lt.s32.totalorder %s442_s14, %s442_s14 }
  0x2c   :  { %p449_p8 = por %p448_p7, %p447_p6 }
  0x2e   :  { %p450_p9 = pnand %p449_p8, %p443_p5 }
  0x30   :  { %453 = shalt.err (!%p450_p9)
}
  0x31   :  { %50 = dma.hbm_to_vmem [thread:$0]  %s566_s3, 2048, %s45_s18, [#allocation6], %s459_s11, %s459_s11, %s460_s12  }
  0x32   :  { %454 = dma.done.wait [#allocation4], 128  }
  0x33   :  { %455 = vsyncadd [#allocation4], 4294967168 }
  0x34   :  { %456 = dma.done.wait [#allocation6], 2560  }
  0x35   :  { %457 = vsyncadd [#allocation6], 4294964736  ;;  %v463_v0 = vmov 0.0|0.0   ;;  %vm464_vm0 = vmmov 0   ;;  %v465_v1 = vmov 0.0   ;;  %v67_v2 = vld [vmem:[#allocation5] sm:$0xff]  ;;  %v264_v51 = vstv %s569_s6 }
  0x36   :  { %346 = vmatprep.subr.bf16.mxu0 %v463_v0  ;;  %308 = vmatprep.mubr.msk.f32.mxu0 %vm464_vm0, %v465_v1  ;;  %v68_v3 = vld [vmem:[#allocation5 + $0x8] sm:$0xff]  ;;  %v69_v4 = vld [vmem:[#allocation5 + $0x10] sm:$0xff]  ;;  %v70_v6 = vld [vmem:[#allocation5 + $0x18] sm:$0xff]  ;;  %vm78_vm1 = vcmask 261120   ;;  %vm266_vm2 = vcmask 7168  }
  0x37   :  { %352 = vmatprep.subr.bf16.mxu1 %v463_v0  ;;  %343 = vmatprep.mubr.msk.f32.mxu1 %vm464_vm0, %v465_v1  ;;  %v347_v5 = vpack.c.bf16 %v68_v3, %v67_v2  ;;  %v156_v7 = vld [vmem:[#allocation7] sm:$0xff]  ;;  %v157_v8 = vld [vmem:[#allocation7 + $0x8] sm:$0xff]  ;;  %v158_v9 = vld [vmem:[#allocation7 + $0x10] sm:$0xff]  ;;  %v350_v11 = vpack.c.bf16 %v70_v6, %v69_v4 }
  0x38   :  { %v159_v10 = vld [vmem:[#allocation7 + $0x18] sm:$0xff]  ;;  %v353_v12 = vpack.c.bf16 %v157_v8, %v156_v7  ;;  %v160_v14 = vld [vmem:[#allocation7 + $0x20] sm:$0xff]  ;;  %v161_v15 = vld [vmem:[#allocation7 + $0x28] sm:$0xff] }
  0x39   :  { %348 = vmatpush3.bf16.msra.mxu0 %v347_v5  ;;  %v356_v13 = vpack.c.bf16 %v159_v10, %v158_v9  ;;  %v66_v16 = vld [vmem:[#allocation3] sm:$0xff]  ;;  %v359_v17 = vpack.c.bf16 %v161_v15, %v160_v14  ;;  %v162_v18 = vld [vmem:[#allocation7 + $0x30] sm:$0xff]  ;;  %v164_v21 = vld [vmem:[#allocation7 + $0x40] sm:$0xff] }
  0x3a   :  { %349 = vmatprep.subr.bf16.mxu0 %v463_v0  ;;  %354 = vmatpush3.bf16.msra.mxu1 %v353_v12  ;;  %v163_v19 = vld [vmem:[#allocation7 + $0x38] sm:$0xff]  ;;  %v165_v22 = vld [vmem:[#allocation7 + $0x48] sm:$0xff]  ;;  %v166_v24 = vld [vmem:[#allocation7 + $0x50] sm:$0xff] }
  0x3b   :  { %355 = vmatprep.subr.bf16.mxu1 %v463_v0  ;;  %v362_v20 = vpack.c.bf16 %v163_v19, %v162_v18  ;;  %v365_v23 = vpack.c.bf16 %v165_v22, %v164_v21  ;;  %v167_v25 = vld [vmem:[#allocation7 + $0x58] sm:$0xff]  ;;  %v168_v27 = vld [vmem:[#allocation7 + $0x60] sm:$0xff]  ;;  %v169_v28 = vld [vmem:[#allocation7 + $0x68] sm:$0xff] }
  0x3c   :  { %v368_v26 = vpack.c.bf16 %v167_v25, %v166_v24  ;;  %v371_v29 = vpack.c.bf16 %v169_v28, %v168_v27  ;;  %v170_v30 = vld [vmem:[#allocation7 + $0x70] sm:$0xff]  ;;  %v171_v31 = vld [vmem:[#allocation7 + $0x78] sm:$0xff] }
  0x3d   :  { %351 = vmatpush3.bf16.msra.mxu0 %v350_v11  ;;  %v374_v32 = vpack.c.bf16 %v171_v31, %v170_v30  ;;  %v274_v33 = vld [vmem:[%s565_s2] ss:$0 sm:$0xff] }
  0x3e   :  { %357 = vmatpush3.bf16.msra.mxu1 %v356_v13  ;;  %v276_v41 = vld [vmem:[%s567_s4] ss:$0 sm:$0xff] }
  0x3f   :  { %358 = vmatprep.subr.bf16.mxu1 %v463_v0  ;;  %v277_v48 = vld [vmem:[%s568_s5] ss:$0 sm:$0xff] }
  0x40   :  { %309 = vmatmul.mubr.msk.f32.vlgmr.msra.gmra.mrb[0].mxu0 %vm78_vm1, %v66_v16 }
  0x42   :  { %360 = vmatpush3.bf16.msra.mxu1 %v359_v17 }
  0x43   :  { %361 = vmatprep.subr.bf16.mxu1 %v463_v0 }
  0x46   :  { %363 = vmatpush3.bf16.msra.mxu1 %v362_v20 }
  0x47   :  { %364 = vmatprep.subr.bf16.mxu1 %v463_v0 }
  0x4a   :  { %366 = vmatpush3.bf16.msra.mxu1 %v365_v23 }
  0x4b   :  { %367 = vmatprep.subr.bf16.mxu1 %v463_v0 }
  0x4e   :  { %369 = vmatpush3.bf16.msra.mxu1 %v368_v26 }
  0x4f   :  { %370 = vmatprep.subr.bf16.mxu1 %v463_v0 }
  0x52   :  { %372 = vmatpush3.bf16.msra.mxu1 %v371_v29 }
  0x53   :  { %373 = vmatprep.subr.bf16.mxu1 %v463_v0 }
  0x56   :  { %375 = vmatpush3.bf16.msra.mxu1 %v374_v32 }
 0x113   :  { %v148_v34 = vpop.f32.mrb[0].mxu0 }
 0x114   :  { %v149_v35 = vadd.f32 %v274_v33, %v148_v34  ;;  %v310_v36 = vpop.f32.mrb[1].mxu0 }
 0x116   :  { %v152_v37 = vmul.f32 0.5, %v149_v35 }
 0x118   :  { %384 = vtanh.f32 %v152_v37 }
 0x122   :  { %v385_v38 = vpop.eup %384 }
 0x123   :  { %v154_v39 = vadd.f32 1.0, %v385_v38 }
 0x125   :  { %v155_v40 = vmul.f32 0.5, %v154_v39 }
 0x127   :  { %344 = vmatmul.mubr.f32.vlgmr.msra.gmra.mrb[0].mxu1 %v155_v40 }
 0x1fa   :  { %v245_v42 = vpop.f32.mrb[0].mxu1 }
 0x1fb   :  { %v246_v43 = vadd.f32 %v276_v41, %v245_v42  ;;  %v345_v44 = vpop.f32.mrb[1].mxu1 }
 0x1fd   :  { %v249_v45 = vmul.f32 0.5, %v246_v43 }
 0x1ff   :  { %386 = vtanh.f32 %v249_v45 }
 0x209   :  { %v387_v46 = vpop.eup %386 }
 0x20a   :  { %v251_v47 = vadd.f32 1.0, %v387_v46 }
 0x20c   :  { %v252_v49 = vmul.f32 0.5, %v251_v47 }
 0x20e   :  { %v260_v50 = vmul.f32 %v277_v48, %v252_v49 }
 0x210   :  { %261 = vadd.xlane.f32.xlu0 %v260_v50 }
 0x29d   :  { %v262_v52 = vpop.xlane.xlu0 %261 }
 0x29e   :  { %v265_v53 = vadd.f32 %v264_v51, %v262_v52 }
 0x2a0   :  { %267 = vst.msk [vmem:[%s570_s7] sm:$0xff] %vm266_vm2, %v265_v53 }
 0x2a1   :  { %272 = vsyncpa [#allocation4], 1 }
 0x2a2   :  { %273 = vsyncpa [#allocation6], 1 }

</bundles_post_ra>
